<compile_context>
chip_gen: v7x
topology: tpu7x:2x2x1
jax: 0.10.0
libtpu: 0.0.40
codegen_flags: <defaults>
</compile_context>

<pallas_src>
import functools

import jax
import jax.numpy as jnp
from jax import lax
from jax.experimental import pallas as pl
from jax.experimental.pallas import tpu as pltpu


def _round_up(x, m):
    return (x + m - 1) // m * m


def _pick_tile_b(padded_b):
    """padded_b is a multiple of 128.  Pick the largest 128-multiple tile that
    (a) divides padded_b exactly (no extra dead rows), (b) is <= 1024 so
    per-step VMEM stays tiny even on v7x's 64 MiB, and (c) leaves >= 2 grid
    steps when possible so both v7x TensorCores get work under
    dimension_semantics=("parallel",)."""
    cap = min(1024, padded_b)
    if padded_b >= 256:
        cap = min(cap, padded_b // 2)
    cap = max(128, (cap // 128) * 128)
    for t in range(cap, 127, -128):
        if padded_b % t == 0:
            return t
    return 128


def _actor_kernel(xT_ref, w1_ref, b1_ref, w2_ref, b2_ref, wh_ref, bh_ref,
                  outT_ref, *, action_dim):
    # Transposed layout: batch on the lane axis.  Weights/biases use constant
    # index_maps, so they stay VMEM-resident across batch-tile grid steps.
    xT = xT_ref[...].astype(jnp.bfloat16)                      # [S, tile_b]

    # Hidden layer 1: Linear + ReLU   (h1T: [H, tile_b], f32 accumulation)
    h1 = jnp.dot(w1_ref[...], xT,
                 preferred_element_type=jnp.float32) + b1_ref[...]
    h1 = jnp.maximum(h1, 0.0)

    # Hidden layer 2: Linear + ReLU   (h2T: [H, tile_b])
    h2 = jnp.dot(w2_ref[...], h1.astype(jnp.bfloat16),
                 preferred_element_type=jnp.float32) + b2_ref[...]
    h2 = jnp.maximum(h2, 0.0)

    # Fused heads: one [out_rows, tile_b] matmul.  Rows [0, A) = mean head,
    # rows [A, 2A) = log_std head, remaining rows are zero padding.
    heads = jnp.dot(wh_ref[...], h2.astype(jnp.bfloat16),
                    preferred_element_type=jnp.float32) + bh_ref[...]

    row = lax.broadcasted_iota(jnp.int32, heads.shape, 0)
    outT_ref[...] = jnp.where(row < action_dim,
                              jnp.tanh(heads),
                              jnp.clip(heads, -20.0, 2.0))


@functools.partial(jax.jit, static_argnames=("action_dim",))
def _actor_forward_impl(state, w1, b1, w2, b2, wh, bh, *, action_dim):
    batch, state_dim = state.shape
    hidden = w1.shape[0]
    out_rows = wh.shape[0]

    padded_b = _round_up(max(batch, 128), 128)
    tile_b = _pick_tile_b(padded_b)
    grid = (padded_b // tile_b,)

    # Layout plumbing in the wrapper: present the state with batch on lanes.
    stateT = jnp.zeros((state_dim, padded_b), state.dtype)
    stateT = stateT.at[:, :batch].set(state.T)

    cost = pl.CostEstimate(
        flops=2 * padded_b * (state_dim * hidden
                              + hidden * hidden
                              + hidden * out_rows),
        transcendentals=padded_b * out_rows,
        bytes_accessed=(padded_b * state_dim * 4                 # state in
                        + padded_b * out_rows * 4                # output
                        + (w1.size + w2.size + wh.size) * 2      # bf16 weights
                        + (b1.size + b2.size + bh.size) * 4),    # f32 biases
    )

    # Constant-index weight/bias blocks could be single-buffered
    # (pipeline_mode=pl.Buffered(1)); negligible at these sizes, so omitted.
    outT = pl.pallas_call(
        functools.partial(_actor_kernel, action_dim=action_dim),
        out_shape=jax.ShapeDtypeStruct((out_rows, padded_b), jnp.float32),
        grid=grid,
        in_specs=[
            pl.BlockSpec((state_dim, tile_b), lambda i: (0, i)),   # state^T
            pl.BlockSpec((hidden, state_dim), lambda i: (0, 0)),   # w1
            pl.BlockSpec((hidden, 1), lambda i: (0, 0)),           # b1
            pl.BlockSpec((hidden, hidden), lambda i: (0, 0)),      # w2
            pl.BlockSpec((hidden, 1), lambda i: (0, 0)),           # b2
            pl.BlockSpec((out_rows, hidden), lambda i: (0, 0)),    # fused heads W
            pl.BlockSpec((out_rows, 1), lambda i: (0, 0)),         # fused heads b
        ],
        out_specs=pl.BlockSpec((out_rows, tile_b), lambda i: (0, i)),
        compiler_params=pltpu.CompilerParams(
            dimension_semantics=("parallel",)),
        cost_estimate=cost,
    )(stateT, w1, b1, w2, b2, wh, bh)

    headsT = outT[:, :batch]                       # strip batch padding
    mean = headsT[:action_dim].T                   # [batch, action_dim]
    log_std = headsT[action_dim:2 * action_dim].T  # [batch, action_dim]
    return mean, log_std


def actor_forward(state, prep):
    """state: [B, state_dim] f32.  prep: output of prepare_params."""
    return _actor_forward_impl(state, prep["w1"], prep["b1"], prep["w2"],
                               prep["b2"], prep["wh"], prep["bh"],
                               action_dim=prep["action_dim"])


def prepare_params(params):
    """One-time (off hot path) weight preparation: fuse the two heads, pad the
    fused head rows to an 8-sublane multiple, cast MXU weights to bf16, and
    reshape biases to column vectors for the lane-broadcast add."""
    hidden = params["w1"].shape[0]
    action_dim = params["wm"].shape[0]
    out_rows = _round_up(2 * action_dim, 8)

    wh = jnp.zeros((out_rows, hidden), jnp.float32)
    wh = wh.at[:action_dim].set(params["wm"])
    wh = wh.at[action_dim:2 * action_dim].set(params["wl"])
    bh = jnp.zeros((out_rows,), jnp.float32)
    bh = bh.at[:action_dim].set(params["bm"])
    bh = bh.at[action_dim:2 * action_dim].set(params["bl"])

    return dict(
        w1=params["w1"].astype(jnp.bfloat16),
        b1=params["b1"].reshape(hidden, 1).astype(jnp.float32),
        w2=params["w2"].astype(jnp.bfloat16),
        b2=params["b2"].reshape(hidden, 1).astype(jnp.float32),
        wh=wh.astype(jnp.bfloat16),
        bh=bh.reshape(out_rows, 1),
        action_dim=action_dim,
    )


def init_actor_params(key, state_dim, action_dim, hidden_dim):
    """nn.Linear-style init U(-1/sqrt(fan_in), 1/sqrt(fan_in)).
    PyTorch layout: weight [out_features, in_features], bias [out_features]."""
    def linear_init(k, fan_in, fan_out):
        kw, kb = jax.random.split(k)
        bound = 1.0 / jnp.sqrt(jnp.float32(fan_in))
        w = jax.random.uniform(kw, (fan_out, fan_in), jnp.float32, -bound, bound)
        b = jax.random.uniform(kb, (fan_out,), jnp.float32, -bound, bound)
        return w, b

    k1, k2, k3, k4 = jax.random.split(key, 4)
    w1, b1 = linear_init(k1, state_dim, hidden_dim)
    w2, b2 = linear_init(k2, hidden_dim, hidden_dim)
    wm, bm = linear_init(k3, hidden_dim, action_dim)
    wl, bl = linear_init(k4, hidden_dim, action_dim)
    return dict(w1=w1, b1=b1, w2=w2, b2=b2, wm=wm, bm=bm, wl=wl, bl=bl)


def actor_forward_ref(state, params, matmul_dtype=jnp.float32):
    """Pure-JAX reference.  matmul_dtype=bfloat16 mirrors the kernel's MXU path."""
    def mm(x, w):
        return jnp.dot(x.astype(matmul_dtype), w.T.astype(matmul_dtype),
                       preferred_element_type=jnp.float32)

    h1 = jnp.maximum(mm(state, params["w1"]) + params["b1"], 0.0)
    h2 = jnp.maximum(mm(h1, params["w2"]) + params["b2"], 0.0)
    mean = jnp.tanh(mm(h2, params["wm"]) + params["bm"])
    log_std = jnp.clip(mm(h2, params["wl"]) + params["bl"], -20.0, 2.0)
    return mean, log_std


if __name__ == "__main__":
    # Small, module-consistent shapes: batch=8 states of dim 6, 2 actions,
    # hidden_dim=32 (module default is 256; 32 keeps the example small).
    batch, state_dim, action_dim, hidden_dim = 8, 6, 2, 32

    key = jax.random.PRNGKey(0)
    k_params, k_state = jax.random.split(key)

    params = init_actor_params(k_params, state_dim, action_dim, hidden_dim)
    prep = prepare_params(params)          # one-time, off the hot path
    state = jax.random.normal(k_state, (batch, state_dim), jnp.float32)

    mean, log_std = actor_forward(state, prep)
    jax.block_until_ready((mean, log_std))

    # Check against the bf16-matmul reference (matches the kernel's MXU path).
    mean_bf, log_std_bf = actor_forward_ref(state, params,
                                            matmul_dtype=jnp.bfloat16)
    assert jnp.allclose(mean, mean_bf, atol=2e-3, rtol=2e-3)
    assert jnp.allclose(log_std, log_std_bf, atol=2e-3, rtol=2e-3)

    # Loose sanity check against the full-f32 reference.
    mean_f32, log_std_f32 = actor_forward_ref(state, params)
    assert jnp.allclose(mean, mean_f32, atol=5e-2, rtol=5e-2)
    assert jnp.allclose(log_std, log_std_f32, atol=5e-2, rtol=5e-2)

    assert mean.shape == (batch, action_dim)
    assert log_std.shape == (batch, action_dim)

    print("KERNEL_OK")
</pallas_src>

<mosaic_0001>
module attributes {stable_mosaic.version = 11 : i64} {
  func.func @_actor_kernel(%arg0: i32, %arg1: memref<6x128xf32, #tpu.memory_space<vmem>>, %arg2: memref<32x6xbf16, #tpu.memory_space<vmem>>, %arg3: memref<32x1xf32, #tpu.memory_space<vmem>>, %arg4: memref<32x32xbf16, #tpu.memory_space<vmem>>, %arg5: memref<32x1xf32, #tpu.memory_space<vmem>>, %arg6: memref<8x32xbf16, #tpu.memory_space<vmem>>, %arg7: memref<8x1xf32, #tpu.memory_space<vmem>>, %arg8: memref<8x128xf32, #tpu.memory_space<vmem>>) attributes {dimension_semantics = [#tpu.dimension_semantics<parallel>], iteration_bounds = array<i64: 1>, scalar_prefetch = 0 : i64, scratch_operands = 0 : i64, tpu.core_type = #tpu.core_type<tc>, window_params = [{transform_indices = @transform_0, window_bounds = array<i64: 6, 128>}, {pipeline_mode = #tpu.pipeline_mode<synchronous>, transform_indices = @transform_1, window_bounds = array<i64: 32, 6>}, {pipeline_mode = #tpu.pipeline_mode<synchronous>, transform_indices = @transform_2, window_bounds = array<i64: 32, 1>}, {pipeline_mode = #tpu.pipeline_mode<synchronous>, transform_indices = @transform_3, window_bounds = array<i64: 32, 32>}, {pipeline_mode = #tpu.pipeline_mode<synchronous>, transform_indices = @transform_4, window_bounds = array<i64: 32, 1>}, {pipeline_mode = #tpu.pipeline_mode<synchronous>, transform_indices = @transform_5, window_bounds = array<i64: 8, 32>}, {pipeline_mode = #tpu.pipeline_mode<synchronous>, transform_indices = @transform_6, window_bounds = array<i64: 8, 1>}, {transform_indices = @transform_7, window_bounds = array<i64: 8, 128>}]} {
    %c0 = arith.constant 0 : index
    %c0_0 = arith.constant 0 : index
    %0 = vector.load %arg1[%c0, %c0_0] : memref<6x128xf32, #tpu.memory_space<vmem>>, vector<6x128xf32>
    %1 = arith.truncf %0 : vector<6x128xf32> to vector<6x128xbf16>
    %c0_1 = arith.constant 0 : index
    %c0_2 = arith.constant 0 : index
    %2 = vector.load %arg2[%c0_1, %c0_2] : memref<32x6xbf16, #tpu.memory_space<vmem>>, vector<32x6xbf16>
    %cst = arith.constant dense<0.000000e+00> : vector<32x128xf32>
    %3 = tpu.matmul %2, %1, %cst {dimension_numbers = #tpu.dot_dimension_numbers<[1], [0], [0], [1], [0, 0, 1, 1], [], []>} : vector<32x6xbf16>, vector<6x128xbf16>, vector<32x128xf32> -> vector<32x128xf32>
    %c0_3 = arith.constant 0 : index
    %c0_4 = arith.constant 0 : index
    %4 = vector.load %arg3[%c0_3, %c0_4] : memref<32x1xf32, #tpu.memory_space<vmem>>, vector<32x1xf32>
    %5 = vector.broadcast %4 : vector<32x1xf32> to vector<32x128xf32>
    %6 = arith.addf %3, %5 : vector<32x128xf32>
    %cst_5 = arith.constant 0.000000e+00 : f32
    %7 = vector.broadcast %cst_5 : f32 to vector<32x128xf32>
    %8 = arith.maximumf %6, %7 : vector<32x128xf32>
    %c0_6 = arith.constant 0 : index
    %c0_7 = arith.constant 0 : index
    %9 = vector.load %arg4[%c0_6, %c0_7] : memref<32x32xbf16, #tpu.memory_space<vmem>>, vector<32x32xbf16>
    %10 = arith.truncf %8 : vector<32x128xf32> to vector<32x128xbf16>
    %cst_8 = arith.constant dense<0.000000e+00> : vector<32x128xf32>
    %11 = tpu.matmul %9, %10, %cst_8 {dimension_numbers = #tpu.dot_dimension_numbers<[1], [0], [0], [1], [0, 0, 1, 1], [], []>} : vector<32x32xbf16>, vector<32x128xbf16>, vector<32x128xf32> -> vector<32x128xf32>
    %c0_9 = arith.constant 0 : index
    %c0_10 = arith.constant 0 : index
    %12 = vector.load %arg5[%c0_9, %c0_10] : memref<32x1xf32, #tpu.memory_space<vmem>>, vector<32x1xf32>
    %13 = vector.broadcast %12 : vector<32x1xf32> to vector<32x128xf32>
    %14 = arith.addf %11, %13 : vector<32x128xf32>
    %cst_11 = arith.constant 0.000000e+00 : f32
    %15 = vector.broadcast %cst_11 : f32 to vector<32x128xf32>
    %16 = arith.maximumf %14, %15 : vector<32x128xf32>
    %c0_12 = arith.constant 0 : index
    %c0_13 = arith.constant 0 : index
    %17 = vector.load %arg6[%c0_12, %c0_13] : memref<8x32xbf16, #tpu.memory_space<vmem>>, vector<8x32xbf16>
    %18 = arith.truncf %16 : vector<32x128xf32> to vector<32x128xbf16>
    %cst_14 = arith.constant dense<0.000000e+00> : vector<8x128xf32>
    %19 = tpu.matmul %17, %18, %cst_14 {dimension_numbers = #tpu.dot_dimension_numbers<[1], [0], [0], [1], [0, 0, 1, 1], [], []>} : vector<8x32xbf16>, vector<32x128xbf16>, vector<8x128xf32> -> vector<8x128xf32>
    %c0_15 = arith.constant 0 : index
    %c0_16 = arith.constant 0 : index
    %20 = vector.load %arg7[%c0_15, %c0_16] : memref<8x1xf32, #tpu.memory_space<vmem>>, vector<8x1xf32>
    %21 = vector.broadcast %20 : vector<8x1xf32> to vector<8x128xf32>
    %22 = arith.addf %19, %21 : vector<8x128xf32>
    %23 = tpu.iota {dimensions = array<i32: 0>} : vector<8x128xi32>
    %c2_i32 = arith.constant 2 : i32
    %24 = vector.broadcast %c2_i32 : i32 to vector<8x128xi32>
    %25 = arith.cmpi slt, %23, %24 : vector<8x128xi32>
    %26 = math.tanh %22 : vector<8x128xf32>
    %cst_17 = arith.constant -2.000000e+01 : f32
    %cst_18 = arith.constant 2.000000e+00 : f32
    %27 = vector.broadcast %cst_17 : f32 to vector<8x128xf32>
    %28 = arith.maximumf %27, %22 : vector<8x128xf32>
    %29 = vector.broadcast %cst_18 : f32 to vector<8x128xf32>
    %30 = arith.minimumf %29, %28 : vector<8x128xf32>
    %31 = arith.select %25, %26, %30 : vector<8x128xi1>, vector<8x128xf32>
    %c0_19 = arith.constant 0 : index
    %c0_20 = arith.constant 0 : index
    %32 = vector.load %arg8[%c0_19, %c0_20] : memref<8x128xf32, #tpu.memory_space<vmem>>, vector<8x128xf32>
    tpu.vector_store %arg8[%c0_19, %c0_20], %31 {strides = array<i32>} : memref<8x128xf32, #tpu.memory_space<vmem>>, vector<8x128xf32>,
    return
  }
  func.func @transform_0(%arg0: i32) -> (i32, i32) {
    %c0_i32 = arith.constant 0 : i32
    %c0_i32_0 = arith.constant 0 : i32
    return %c0_i32, %arg0 : i32, i32
  }
  func.func @transform_1(%arg0: i32) -> (i32, i32) {
    %c0_i32 = arith.constant 0 : i32
    %c0_i32_0 = arith.constant 0 : i32
    %c0_i32_1 = arith.constant 0 : i32
    return %c0_i32, %c0_i32_0 : i32, i32
  }
  func.func @transform_2(%arg0: i32) -> (i32, i32) {
    %c0_i32 = arith.constant 0 : i32
    %c0_i32_0 = arith.constant 0 : i32
    %c0_i32_1 = arith.constant 0 : i32
    return %c0_i32, %c0_i32_0 : i32, i32
  }
  func.func @transform_3(%arg0: i32) -> (i32, i32) {
    %c0_i32 = arith.constant 0 : i32
    %c0_i32_0 = arith.constant 0 : i32
    %c0_i32_1 = arith.constant 0 : i32
    return %c0_i32, %c0_i32_0 : i32, i32
  }
  func.func @transform_4(%arg0: i32) -> (i32, i32) {
    %c0_i32 = arith.constant 0 : i32
    %c0_i32_0 = arith.constant 0 : i32
    %c0_i32_1 = arith.constant 0 : i32
    return %c0_i32, %c0_i32_0 : i32, i32
  }
  func.func @transform_5(%arg0: i32) -> (i32, i32) {
    %c0_i32 = arith.constant 0 : i32
    %c0_i32_0 = arith.constant 0 : i32
    %c0_i32_1 = arith.constant 0 : i32
    return %c0_i32, %c0_i32_0 : i32, i32
  }
  func.func @transform_6(%arg0: i32) -> (i32, i32) {
    %c0_i32 = arith.constant 0 : i32
    %c0_i32_0 = arith.constant 0 : i32
    %c0_i32_1 = arith.constant 0 : i32
    return %c0_i32, %c0_i32_0 : i32, i32
  }
  func.func @transform_7(%arg0: i32) -> (i32, i32) {
    %c0_i32 = arith.constant 0 : i32
    %c0_i32_0 = arith.constant 0 : i32
    return %c0_i32, %arg0 : i32, i32
  }
}

</mosaic_0001>

<bundles_post_ra>
// kernel: _actor_forward_impl.1
= control target key start
LH: loop header
LB: loop body
LE: loop exit
PB: predicated region body
PF: predicated region fallthrough
CT: control target
= control target key end

     0   :  { %vm74_vm0 = vcmask 1042432   ;;  %vm67_vm1 = vcmask 48128   ;;  %v348_v1 = vmov 0   ;;  %vm171_vm2 = vcmask 261120   ;;  %s444_s0 = inlined_call_operand.vmem [shape: f32[6,128], index: 0, kind: input, shape index: {}]   ;;  %s445_s1 = inlined_call_operand.vmem [shape: bf16[32,6], index: 1, kind: input, shape index: {}]   ;;  %s446_s2 = inlined_call_operand.vmem [shape: f32[32,1], index: 2, kind: input, shape index: {}]   ;;  %s447_s4 = inlined_call_operand.vmem [shape: f32[32,1], index: 4, kind: input, shape index: {}]   ;;  %s448_s6 = inlined_call_operand.vmem [shape: f32[8,1], index: 6, kind: input, shape index: {}]   ;;  %s449_s3 = inlined_call_operand.vmem [shape: bf16[32,32], index: 3, kind: input, shape index: {}]   ;;  %s450_s5 = inlined_call_operand.vmem [shape: bf16[8,32], index: 5, kind: input, shape index: {}]   ;;  %s451_s7 = inlined_call_operand.vmem [shape: f32[8,128], index: 7, kind: output, shape index: {}]  }
   0x1   :  { %v27_v0 = vld [vmem:[%s444_s0] sm:$0x3f]  ;;  %340 = vset.pattern.permute.xlu0 %v348_v1  ;;  %341 = vset.pattern.permute.xlu1 %v348_v1  ;;  %v343_v6 = vld [vmem:[%s445_s1 + $0x8] sm:$0xff]   ;;  %v35_v7 = vld [vmem:[%s446_s2 + $0x10] sm:$0xff]  ;;  %v349_v35 = vmov 0.0   ;;  %vm350_vm3 = vmmov 0   ;;  %v283_v60 = vlaneseq }
   0x2   :  { %v28_v2 = vpack.c.bf16 %v27_v0, %v27_v0  ;;  %v342_v3 = vld [vmem:[%s445_s1] sm:$0xff]   ;;  %v34_v8 = vld [vmem:[%s446_s2 + $0x8] sm:$0xff]  ;;  %49 = vperm.xlu1 %341, %v35_v7   ;;  %v36_v9 = vld [vmem:[%s446_s2 + $0x18] sm:$0xff] }
   0x3   :  { %v33_v4 = vld [vmem:[%s446_s2] sm:$0xff]  ;;  %316 = vmatprep.mubr.msk.bf16.mxu0 %vm67_vm1, %v342_v3  ;;  %v138_v11 = vld [vmem:[%s447_s4 + $0x8] sm:$0xff]  ;;  %v139_v12 = vld [vmem:[%s447_s4 + $0x10] sm:$0xff]  ;;  %v284_v62 = vshrl.u32 %v283_v60, 7 }
   0x4   :  { %336 = vmatprep.subr.msk.bf16.mxu0 %vm74_vm0, %v28_v2  ;;  %v76_v5 = vsel %vm74_vm0, %v28_v2, 0  ;;  %39 = vperm.xlu0 %340, %v33_v4   ;;  %v137_v10 = vld [vmem:[%s447_s4] sm:$0xff]  ;;  %v140_v13 = vld [vmem:[%s447_s4 + $0x18] sm:$0xff]  ;;  %v345_v34 = vld [vmem:[%s449_s3 + $0x8] sm:$0xff]  }
   0x5   :  { %315 = vmatpush3.bf16.msra.mxu0 %v76_v5  ;;  %v234_v14 = vld [vmem:[%s448_s6] sm:$0xff]  ;;  %vm285_vm4 = vcmp.lt.s32.totalorder %v284_v62, 2 }
   0x6   :  { %54 = vperm.xlu1 %341, %v36_v9   ;;  %v344_v15 = vld [vmem:[%s449_s3] sm:$0xff]   ;;  %328 = vmatprep.subr.bf16.mxu0 %v349_v35 }
   0x7   :  { %324 = vmatprep.mubr.msk.bf16.mxu1 %vm171_vm2, %v344_v15  ;;  %v231_v54 = vld [vmem:[%s450_s5] sm:$0xf] }
   0x8   :  { %317 = vmatmul.mubr.msk.bf16.vlgmr.msra.gmra.mrb[0].mxu0 %vm67_vm1, %v343_v6  ;;  %44 = vperm.xlu0 %340, %v34_v8  }
   0x9   :  { %332 = vmatprep.mubr.msk.bf16.mxu0 %vm350_vm3, %v349_v35 }
   0xa   :  { %148 = vperm.xlu1 %341, %v138_v11  }
   0xc   :  { %143 = vperm.xlu0 %340, %v137_v10  }
   0xe   :  { %158 = vperm.xlu1 %341, %v140_v13  }
  0x10   :  { %153 = vperm.xlu0 %340, %v139_v12  }
  0x14   :  { %237 = vperm.xlu0 %340, %v234_v14  }
  0x81   :  { %v50_v16 = vpop.permute.xlu1 %49 }
  0x83   :  { %v40_v17 = vpop.permute.xlu0 %39 }
  0x85   :  { %v55_v21 = vpop.permute.xlu1 %54 }
  0x87   :  { %v45_v24 = vpop.permute.xlu0 %44 }
  0x89   :  { %v149_v37 = vpop.permute.xlu1 %148 }
  0x8b   :  { %v144_v36 = vpop.permute.xlu0 %143 }
  0x8d   :  { %v159_v42 = vpop.permute.xlu1 %158 }
  0x8f   :  { %v154_v38 = vpop.permute.xlu0 %153 }
  0x93   :  { %v238_v55 = vpop.permute.xlu0 %237 }
  0xdb   :  { %v318_v18 = vpop.f32.mrb[0].mxu0 }
  0xdc   :  { %v121_v19 = vadd.f32 %v318_v18, %v50_v16  ;;  %v112_v20 = vpop.f32.mrb[1].mxu0 }
  0xdd   :  { %v113_v22 = vadd.f32 %v112_v20, %v40_v17  ;;  %v319_v23 = vpop.f32.mrb[2].mxu0 }
  0xde   :  { %v124_v25 = vadd.f32 %v319_v23, %v55_v21  ;;  %v115_v26 = vpop.f32.mrb[3].mxu0  ;;  %v129_v28 = vmax.f32 %v121_v19, 0.0 }
  0xdf   :  { %v116_v27 = vadd.f32 %v115_v26, %v45_v24  ;;  %v127_v30 = vmax.f32 %v113_v22, 0.0 }
  0xe0   :  { %v130_v29 = vmax.f32 %v124_v25, 0.0 }
  0xe1   :  { %v128_v31 = vmax.f32 %v116_v27, 0.0 }
  0xe2   :  { %v136_v32 = vpack.c.bf16 %v130_v29, %v129_v28 }
  0xe3   :  { %v135_v33 = vpack.c.bf16 %v128_v31, %v127_v30 }
  0xe5   :  { %320 = vmatprep.subr.bf16.mxu1 %v135_v33 }
  0xe6   :  { %321 = vmatpush3.bf16.msra.mxu1 %v135_v33 }
  0xe7   :  { %322 = vmatprep.subr.bf16.mxu1 %v136_v32 }
  0xea   :  { %323 = vmatpush3.bf16.msra.mxu1 %v136_v32 }
  0xed   :  { %325 = vmatmul.mubr.msk.bf16.vlgmr.msra.gmra.mrb[0].mxu1 %vm171_vm2, %v345_v34 }
 0x1c0   :  { %v326_v39 = vpop.f32.mrb[0].mxu1 }
 0x1c1   :  { %v221_v40 = vadd.f32 %v326_v39, %v154_v38  ;;  %v212_v41 = vpop.f32.mrb[1].mxu1 }
 0x1c2   :  { %v213_v43 = vadd.f32 %v212_v41, %v144_v36  ;;  %v327_v44 = vpop.f32.mrb[2].mxu1 }
 0x1c3   :  { %v224_v45 = vadd.f32 %v327_v44, %v159_v42  ;;  %v215_v46 = vpop.f32.mrb[3].mxu1  ;;  %v229_v48 = vmax.f32 %v221_v40, 0.0 }
 0x1c4   :  { %v216_v47 = vadd.f32 %v215_v46, %v149_v37  ;;  %v227_v50 = vmax.f32 %v213_v43, 0.0 }
 0x1c5   :  { %v230_v49 = vmax.f32 %v224_v45, 0.0 }
 0x1c6   :  { %v228_v51 = vmax.f32 %v216_v47, 0.0 }
 0x1c7   :  { %v233_v52 = vpack.c.bf16 %v230_v49, %v229_v48 }
 0x1c8   :  { %v232_v53 = vpack.c.bf16 %v228_v51, %v227_v50 }
 0x1ca   :  { %329 = vmatpush3.bf16.msra.mxu0 %v232_v53 }
 0x1cb   :  { %330 = vmatprep.subr.bf16.mxu0 %v349_v35 }
 0x1ce   :  { %331 = vmatpush3.bf16.msra.mxu0 %v233_v52 }
 0x1d1   :  { %333 = vmatmul.mubr.msk.bf16.vlgmr.msra.gmra.mrb[4].mxu0 %vm171_vm2, %v231_v54 }
 0x2a4   :  { %v277_v56 = vpop.f32.mrb[4].mxu0 }
 0x2a5   :  { %v278_v57 = vadd.f32 %v277_v56, %v238_v55  ;;  %v334_v58 = vpop.f32.mrb[5].mxu0 }
 0x2a6   :  { %v280_v59 = vpop.f32.mrb[6].mxu0 }
 0x2a7   :  { %346 = vtanh.f32 %v278_v57  ;;  %v335_v61 = vpop.f32.mrb[7].mxu0  ;;  %v287_v63 = vmax.f32 %v278_v57, -20.0 }
 0x2a9   :  { %v288_v0 = vmin.f32 %v287_v63, 2.0 }
 0x2b1   :  { %v347_v1 = vpop.eup %346 }
 0x2b2   :  { %v289_v2 = vsel %vm285_vm4, %v347_v1, %v288_v0 }
 0x2b3   :  { %290 = vst [vmem:[%s451_s7] sm:$0xff] %v289_v2 }

</bundles_post_ra>
